<compile_context>
chip_gen: v7x
topology: tpu7x:2x2x1
jax: 0.10.0
libtpu: 0.0.40
codegen_flags: <defaults>
</compile_context>

<pallas_src>
import functools

import jax
import jax.numpy as jnp
from jax.experimental import pallas as pl
from jax.experimental.pallas import tpu as pltpu


# ----------------------------------------------------------------------------
# Pallas kernel: matmul + bias + optional ReLU, tiled over M
# ----------------------------------------------------------------------------
def _linear_kernel(x_ref, w_ref, b_ref, o_ref, *, apply_relu):
    x = x_ref[...].astype(jnp.bfloat16)           # bf16 MXU path
    acc = jnp.dot(x, w_ref[...], preferred_element_type=jnp.float32)
    acc = acc + b_ref[...]                        # (1, N) broadcasts over (tm, N)
    if apply_relu:
        acc = jnp.maximum(acc, 0.0)
    o_ref[...] = acc.astype(o_ref.dtype)


def linear(x, w_bf16, b2d, *, apply_relu=False, tm_max=512):
    """y = x @ w + b with optional fused ReLU.

    x: (M, K) f32 (unpadded), w_bf16: (K, N) bf16, b2d: (1, N) f32.
    Block shapes use full-array dims (K, N exempt from lane divisibility);
    only M is tiled, with a ragged last tile (no wasted padded rows).
    """
    M, K = x.shape
    Kw, N = w_bf16.shape
    assert K == Kw, (K, Kw)

    if M <= tm_max:
        tm, grid_m = M, 1                 # full-dim block, exempt from 8-row rule
    else:
        tm, grid_m = tm_max, pl.cdiv(M, tm_max)   # tm_max is a multiple of 8

    return pl.pallas_call(
        functools.partial(_linear_kernel, apply_relu=apply_relu),
        out_shape=jax.ShapeDtypeStruct((M, N), jnp.float32),
        grid=(grid_m,),
        in_specs=[
            pl.BlockSpec((tm, K), lambda i: (i, 0)),
            pl.BlockSpec((K, N), lambda i: (0, 0)),
            pl.BlockSpec((1, N), lambda i: (0, 0)),
        ],
        out_specs=pl.BlockSpec((tm, N), lambda i: (i, 0)),
        compiler_params=pltpu.CompilerParams(
            dimension_semantics=("parallel",)),
    )(x, w_bf16, b2d)


# ----------------------------------------------------------------------------
# Pallas kernel: fused MLP head  relu(x @ W1 + b1) @ Wh + bh  (fc1 + V + A)
# ----------------------------------------------------------------------------
def _mlp_heads_kernel(x_ref, w1_ref, b1_ref, wh_ref, bh_ref, o_ref):
    x = x_ref[...].astype(jnp.bfloat16)
    h = jnp.dot(x, w1_ref[...], preferred_element_type=jnp.float32)
    h = jnp.maximum(h + b1_ref[...], 0.0)
    o = jnp.dot(h.astype(jnp.bfloat16), wh_ref[...],
                preferred_element_type=jnp.float32)
    o_ref[...] = (o + bh_ref[...]).astype(o_ref.dtype)


def mlp_heads(x, w1, b1_2d, wh, bh_2d, *, tb_max=512):
    """x: (B, K) f32; w1: (K, H) bf16; wh: (H, Nh) bf16.  Returns (B, Nh) f32.

    Batch is tiled over a parallel grid axis so both v7x TensorCores get work
    and the per-step activation block stays well inside scoped VMEM.
    """
    B, K = x.shape
    K1, H = w1.shape
    H2, Nh = wh.shape
    assert K == K1 and H == H2

    if B <= tb_max:
        tb, grid_b = B, 1
    else:
        tb, grid_b = tb_max, pl.cdiv(B, tb_max)

    return pl.pallas_call(
        _mlp_heads_kernel,
        out_shape=jax.ShapeDtypeStruct((B, Nh), jnp.float32),
        grid=(grid_b,),
        in_specs=[
            pl.BlockSpec((tb, K), lambda i: (i, 0)),
            pl.BlockSpec((K, H), lambda i: (0, 0)),
            pl.BlockSpec((1, H), lambda i: (0, 0)),
            pl.BlockSpec((H, Nh), lambda i: (0, 0)),
            pl.BlockSpec((1, Nh), lambda i: (0, 0)),
        ],
        out_specs=pl.BlockSpec((tb, Nh), lambda i: (i, 0)),
        compiler_params=pltpu.CompilerParams(
            dimension_semantics=("parallel",)),
    )(x, w1, b1_2d, wh, bh_2d)


# ----------------------------------------------------------------------------
# Conv2d (valid padding, square stride) via NHWC im2col + Pallas GEMM
# ----------------------------------------------------------------------------
def _im2col_nhwc(x, kh, kw, stride):
    """x: (B,H,W,C) -> patches (B*OH*OW, kh*kw*C) in (kh, kw, C) column order.

    Built as a last-axis concat of strided slices: no multi-axis transpose,
    the trailing reshape is contiguous.
    """
    B, H, W, C = x.shape
    OH = (H - kh) // stride + 1
    OW = (W - kw) // stride + 1
    slices = []
    for i in range(kh):
        for j in range(kw):
            slices.append(
                x[:, i:i + stride * (OH - 1) + 1:stride,
                     j:j + stride * (OW - 1) + 1:stride, :])
    patches = jnp.concatenate(slices, axis=-1)          # (B, OH, OW, kh*kw*C)
    return patches.reshape(B * OH * OW, kh * kw * C), OH, OW


def conv2d_nhwc(x, w_flat, b2d, kh, kw, stride, *, apply_relu):
    """x: (B,H,W,C); w_flat: (kh*kw*C, O) bf16 (pre-reordered); b2d: (1, O)."""
    # TODO(synk): fold im2col for conv1 into the Pallas kernel (in-kernel
    # strided loads from an ANY/VMEM-resident NHWC input) to avoid
    # materializing the duplicated patch tensor in HBM.
    B = x.shape[0]
    patches, OH, OW = _im2col_nhwc(x, kh, kw, stride)
    y = linear(patches, w_flat, b2d, apply_relu=apply_relu)   # (B*OH*OW, O)
    return y.reshape(B, OH, OW, w_flat.shape[1])              # contiguous reshape


# ----------------------------------------------------------------------------
# DuelingDQNetwork parameters (PyTorch layout) + one-time TPU prep + forward
# ----------------------------------------------------------------------------
def _uniform(key, shape, fan_in):
    bound = 1.0 / jnp.sqrt(jnp.float32(fan_in))
    return jax.random.uniform(key, shape, jnp.float32, -bound, bound)


def init_params(key, input_dims, n_actions):
    """Parameters in PyTorch layouts (Conv2d (O,C,kh,kw), Linear (out,in))."""
    C, H, W = input_dims
    keys = jax.random.split(key, 12)

    def conv_out(h, k, s):
        return (h - k) // s + 1

    h1, w1 = conv_out(H, 8, 4), conv_out(W, 8, 4)
    h2, w2 = conv_out(h1, 4, 2), conv_out(w1, 4, 2)
    h3, w3 = conv_out(h2, 3, 1), conv_out(w2, 3, 1)
    fc_in = 64 * h3 * w3

    params = {
        "conv1_w": _uniform(keys[0], (32, C, 8, 8), C * 8 * 8),
        "conv1_b": _uniform(keys[1], (32,), C * 8 * 8),
        "conv2_w": _uniform(keys[2], (64, 32, 4, 4), 32 * 4 * 4),
        "conv2_b": _uniform(keys[3], (64,), 32 * 4 * 4),
        "conv3_w": _uniform(keys[4], (64, 64, 3, 3), 64 * 3 * 3),
        "conv3_b": _uniform(keys[5], (64,), 64 * 3 * 3),
        "fc1_w": _uniform(keys[6], (512, fc_in), fc_in),   # PyTorch (out, in)
        "fc1_b": _uniform(keys[7], (512,), fc_in),
        "V_w": _uniform(keys[8], (1, 512), 512),
        "V_b": _uniform(keys[9], (1,), 512),
        "A_w": _uniform(keys[10], (n_actions, 512), 512),
        "A_b": _uniform(keys[11], (n_actions,), 512),
    }
    return params, (h3, w3)


def prepare_params(params, h3, w3):
    """One-time (outside the per-step forward) layout prep:
      * conv weights -> (kh*kw*C, O) bf16 matching the NHWC im2col column order
      * fc1 weight   -> (h3*w3*C, 512) bf16 matching the NHWC flatten order
      * V/A heads    -> single (512, 1 + n_actions) bf16 slab
      * biases kept f32 as (1, N) rows
    """
    def conv_prep(w, b):
        O, C, kh, kw = w.shape
        wf = jnp.transpose(w, (2, 3, 1, 0)).reshape(kh * kw * C, O)
        return wf.astype(jnp.bfloat16), b.reshape(1, O).astype(jnp.float32)

    c1w, c1b = conv_prep(params["conv1_w"], params["conv1_b"])
    c2w, c2b = conv_prep(params["conv2_w"], params["conv2_b"])
    c3w, c3b = conv_prep(params["conv3_w"], params["conv3_b"])

    c_out = params["conv3_w"].shape[0]                     # 64
    H = params["fc1_w"].shape[0]                           # 512
    # PyTorch fc1 flatten order is (C, h, w); our NHWC flatten is (h, w, C).
    fc1 = params["fc1_w"].reshape(H, c_out, h3, w3)
    fc1 = jnp.transpose(fc1, (2, 3, 1, 0)).reshape(h3 * w3 * c_out, H)

    head_w = jnp.concatenate([params["V_w"], params["A_w"]], axis=0).T  # (512, 1+nA)
    head_b = jnp.concatenate([params["V_b"], params["A_b"]], axis=0).reshape(1, -1)

    return {
        "conv1_w": c1w, "conv1_b": c1b,
        "conv2_w": c2w, "conv2_b": c2b,
        "conv3_w": c3w, "conv3_b": c3b,
        "fc1_w": fc1.astype(jnp.bfloat16),
        "fc1_b": params["fc1_b"].reshape(1, H).astype(jnp.float32),
        "head_w": head_w.astype(jnp.bfloat16),
        "head_b": head_b.astype(jnp.float32),
    }


def dueling_dqn_forward(prep, state_nchw):
    """state_nchw: (B, C, H, W), PyTorch convention.  Returns (V, A)."""
    x = jnp.transpose(state_nchw, (0, 2, 3, 1))            # single NCHW->NHWC transpose
    # x = relu(conv1(state)); x = relu(conv2(x)); x = relu(conv3(x)) (relu after
    # flatten == relu before flatten, elementwise)
    x = conv2d_nhwc(x, prep["conv1_w"], prep["conv1_b"], 8, 8, 4, apply_relu=True)
    x = conv2d_nhwc(x, prep["conv2_w"], prep["conv2_b"], 4, 4, 2, apply_relu=True)
    x = conv2d_nhwc(x, prep["conv3_w"], prep["conv3_b"], 3, 3, 1, apply_relu=True)
    B = x.shape[0]
    x = x.reshape(B, -1)                                   # NHWC flatten (fc1_w pre-reordered)

    # Fused: x = relu(fc1(x));  [V | A] = x @ [V_w | A_w]^T + [V_b | A_b]
    out = mlp_heads(x, prep["fc1_w"], prep["fc1_b"],
                    prep["head_w"], prep["head_b"])        # (B, 1 + n_actions)
    n_actions = prep["head_w"].shape[1] - 1
    V = out[:, :1]
    A = out[:, 1:1 + n_actions]
    return V, A


if __name__ == "__main__":
    # Small but conv-pipeline-consistent shapes: 36x36 -> 8x8 -> 3x3 -> 1x1
    batch, n_actions = 2, 6
    input_dims = (4, 36, 36)

    key = jax.random.PRNGKey(0)
    pkey, xkey = jax.random.split(key)
    params, (h3, w3) = init_params(pkey, input_dims, n_actions)
    prep = prepare_params(params, h3, w3)
    state = jax.random.normal(xkey, (batch, *input_dims), jnp.float32)

    fwd = jax.jit(dueling_dqn_forward)
    V, A = fwd(prep, state)
    V, A = jax.block_until_ready(V), jax.block_until_ready(A)

    assert V.shape == (batch, 1), V.shape
    assert A.shape == (batch, n_actions), A.shape
    assert V.dtype == jnp.float32 and A.dtype == jnp.float32
    assert bool(jnp.all(jnp.isfinite(V))) and bool(jnp.all(jnp.isfinite(A)))
    print("KERNEL_OK")
</pallas_src>

<mosaic_0001>
module attributes {stable_mosaic.version = 11 : i64} {
  func.func @_linear_kernel(%arg0: i32, %arg1: memref<128x256xf32, #tpu.memory_space<vmem>>, %arg2: memref<256x32xbf16, #tpu.memory_space<vmem>>, %arg3: memref<1x32xf32, #tpu.memory_space<vmem>>, %arg4: memref<128x32xf32, #tpu.memory_space<vmem>>) attributes {dimension_semantics = [#tpu.dimension_semantics<parallel>], iteration_bounds = array<i64: 1>, scalar_prefetch = 0 : i64, scratch_operands = 0 : i64, tpu.core_type = #tpu.core_type<tc>, window_params = [{transform_indices = @transform_0, window_bounds = array<i64: 128, 256>}, {pipeline_mode = #tpu.pipeline_mode<synchronous>, transform_indices = @transform_1, window_bounds = array<i64: 256, 32>}, {pipeline_mode = #tpu.pipeline_mode<synchronous>, transform_indices = @transform_2, window_bounds = array<i64: 1, 32>}, {transform_indices = @transform_3, window_bounds = array<i64: 128, 32>}]} {
    %c0 = arith.constant 0 : index
    %c0_0 = arith.constant 0 : index
    %0 = vector.load %arg1[%c0, %c0_0] : memref<128x256xf32, #tpu.memory_space<vmem>>, vector<128x256xf32>
    %1 = arith.truncf %0 : vector<128x256xf32> to vector<128x256xbf16>
    %c0_1 = arith.constant 0 : index
    %c0_2 = arith.constant 0 : index
    %2 = vector.load %arg2[%c0_1, %c0_2] : memref<256x32xbf16, #tpu.memory_space<vmem>>, vector<256x32xbf16>
    %cst = arith.constant dense<0.000000e+00> : vector<128x32xf32>
    %3 = tpu.matmul %1, %2, %cst {dimension_numbers = #tpu.dot_dimension_numbers<[1], [0], [0], [1], [0, 0, 1, 1], [], []>} : vector<128x256xbf16>, vector<256x32xbf16>, vector<128x32xf32> -> vector<128x32xf32>
    %c0_3 = arith.constant 0 : index
    %c0_4 = arith.constant 0 : index
    %4 = vector.load %arg3[%c0_3, %c0_4] : memref<1x32xf32, #tpu.memory_space<vmem>>, vector<1x32xf32>
    %5 = vector.broadcast %4 : vector<1x32xf32> to vector<128x32xf32>
    %6 = arith.addf %3, %5 : vector<128x32xf32>
    %cst_5 = arith.constant 0.000000e+00 : f32
    %7 = vector.broadcast %cst_5 : f32 to vector<128x32xf32>
    %8 = arith.maximumf %6, %7 : vector<128x32xf32>
    %c0_6 = arith.constant 0 : index
    %c0_7 = arith.constant 0 : index
    %9 = vector.load %arg4[%c0_6, %c0_7] : memref<128x32xf32, #tpu.memory_space<vmem>>, vector<128x32xf32>
    tpu.vector_store %arg4[%c0_6, %c0_7], %8 {strides = array<i32>} : memref<128x32xf32, #tpu.memory_space<vmem>>, vector<128x32xf32>,
    return
  }
  func.func @transform_0(%arg0: i32) -> (i32, i32) {
    %c0_i32 = arith.constant 0 : i32
    %c0_i32_0 = arith.constant 0 : i32
    return %arg0, %c0_i32 : i32, i32
  }
  func.func @transform_1(%arg0: i32) -> (i32, i32) {
    %c0_i32 = arith.constant 0 : i32
    %c0_i32_0 = arith.constant 0 : i32
    %c0_i32_1 = arith.constant 0 : i32
    return %c0_i32, %c0_i32_0 : i32, i32
  }
  func.func @transform_2(%arg0: i32) -> (i32, i32) {
    %c0_i32 = arith.constant 0 : i32
    %c0_i32_0 = arith.constant 0 : i32
    %c0_i32_1 = arith.constant 0 : i32
    return %c0_i32, %c0_i32_0 : i32, i32
  }
  func.func @transform_3(%arg0: i32) -> (i32, i32) {
    %c0_i32 = arith.constant 0 : i32
    %c0_i32_0 = arith.constant 0 : i32
    return %arg0, %c0_i32 : i32, i32
  }
}

module attributes {stable_mosaic.version = 11 : i64} {
  func.func @_linear_kernel(%arg0: i32, %arg1: memref<18x512xf32, #tpu.memory_space<vmem>>, %arg2: memref<512x64xbf16, #tpu.memory_space<vmem>>, %arg3: memref<1x64xf32, #tpu.memory_space<vmem>>, %arg4: memref<18x64xf32, #tpu.memory_space<vmem>>) attributes {dimension_semantics = [#tpu.dimension_semantics<parallel>], iteration_bounds = array<i64: 1>, scalar_prefetch = 0 : i64, scratch_operands = 0 : i64, tpu.core_type = #tpu.core_type<tc>, window_params = [{transform_indices = @transform_0, window_bounds = array<i64: 18, 512>}, {pipeline_mode = #tpu.pipeline_mode<synchronous>, transform_indices = @transform_1, window_bounds = array<i64: 512, 64>}, {pipeline_mode = #tpu.pipeline_mode<synchronous>, transform_indices = @transform_2, window_bounds = array<i64: 1, 64>}, {transform_indices = @transform_3, window_bounds = array<i64: 18, 64>}]} {
    %c0 = arith.constant 0 : index
    %c0_0 = arith.constant 0 : index
    %0 = vector.load %arg1[%c0, %c0_0] : memref<18x512xf32, #tpu.memory_space<vmem>>, vector<18x512xf32>
    %1 = arith.truncf %0 : vector<18x512xf32> to vector<18x512xbf16>
    %c0_1 = arith.constant 0 : index
    %c0_2 = arith.constant 0 : index
    %2 = vector.load %arg2[%c0_1, %c0_2] : memref<512x64xbf16, #tpu.memory_space<vmem>>, vector<512x64xbf16>
    %cst = arith.constant dense<0.000000e+00> : vector<18x64xf32>
    %3 = tpu.matmul %1, %2, %cst {dimension_numbers = #tpu.dot_dimension_numbers<[1], [0], [0], [1], [0, 0, 1, 1], [], []>} : vector<18x512xbf16>, vector<512x64xbf16>, vector<18x64xf32> -> vector<18x64xf32>
    %c0_3 = arith.constant 0 : index
    %c0_4 = arith.constant 0 : index
    %4 = vector.load %arg3[%c0_3, %c0_4] : memref<1x64xf32, #tpu.memory_space<vmem>>, vector<1x64xf32>
    %5 = vector.broadcast %4 : vector<1x64xf32> to vector<18x64xf32>
    %6 = arith.addf %3, %5 : vector<18x64xf32>
    %cst_5 = arith.constant 0.000000e+00 : f32
    %7 = vector.broadcast %cst_5 : f32 to vector<18x64xf32>
    %8 = arith.maximumf %6, %7 : vector<18x64xf32>
    %c0_6 = arith.constant 0 : index
    %c0_7 = arith.constant 0 : index
    %9 = vector.load %arg4[%c0_6, %c0_7] : memref<18x64xf32, #tpu.memory_space<vmem>>, vector<18x64xf32>
    tpu.vector_store %arg4[%c0_6, %c0_7], %8 {strides = array<i32>} : memref<18x64xf32, #tpu.memory_space<vmem>>, vector<18x64xf32>,
    return
  }
  func.func @transform_0(%arg0: i32) -> (i32, i32) {
    %c0_i32 = arith.constant 0 : i32
    %c0_i32_0 = arith.constant 0 : i32
    return %arg0, %c0_i32 : i32, i32
  }
  func.func @transform_1(%arg0: i32) -> (i32, i32) {
    %c0_i32 = arith.constant 0 : i32
    %c0_i32_0 = arith.constant 0 : i32
    %c0_i32_1 = arith.constant 0 : i32
    return %c0_i32, %c0_i32_0 : i32, i32
  }
  func.func @transform_2(%arg0: i32) -> (i32, i32) {
    %c0_i32 = arith.constant 0 : i32
    %c0_i32_0 = arith.constant 0 : i32
    %c0_i32_1 = arith.constant 0 : i32
    return %c0_i32, %c0_i32_0 : i32, i32
  }
  func.func @transform_3(%arg0: i32) -> (i32, i32) {
    %c0_i32 = arith.constant 0 : i32
    %c0_i32_0 = arith.constant 0 : i32
    return %arg0, %c0_i32 : i32, i32
  }
}

module attributes {stable_mosaic.version = 11 : i64} {
  func.func @_linear_kernel(%arg0: i32, %arg1: memref<2x576xf32, #tpu.memory_space<vmem>>, %arg2: memref<576x64xbf16, #tpu.memory_space<vmem>>, %arg3: memref<1x64xf32, #tpu.memory_space<vmem>>, %arg4: memref<2x64xf32, #tpu.memory_space<vmem>>) attributes {dimension_semantics = [#tpu.dimension_semantics<parallel>], iteration_bounds = array<i64: 1>, scalar_prefetch = 0 : i64, scratch_operands = 0 : i64, tpu.core_type = #tpu.core_type<tc>, window_params = [{transform_indices = @transform_0, window_bounds = array<i64: 2, 576>}, {pipeline_mode = #tpu.pipeline_mode<synchronous>, transform_indices = @transform_1, window_bounds = array<i64: 576, 64>}, {pipeline_mode = #tpu.pipeline_mode<synchronous>, transform_indices = @transform_2, window_bounds = array<i64: 1, 64>}, {transform_indices = @transform_3, window_bounds = array<i64: 2, 64>}]} {
    %c0 = arith.constant 0 : index
    %c0_0 = arith.constant 0 : index
    %0 = vector.load %arg1[%c0, %c0_0] : memref<2x576xf32, #tpu.memory_space<vmem>>, vector<2x576xf32>
    %1 = arith.truncf %0 : vector<2x576xf32> to vector<2x576xbf16>
    %c0_1 = arith.constant 0 : index
    %c0_2 = arith.constant 0 : index
    %2 = vector.load %arg2[%c0_1, %c0_2] : memref<576x64xbf16, #tpu.memory_space<vmem>>, vector<576x64xbf16>
    %cst = arith.constant dense<0.000000e+00> : vector<2x64xf32>
    %3 = tpu.matmul %1, %2, %cst {dimension_numbers = #tpu.dot_dimension_numbers<[1], [0], [0], [1], [0, 0, 1, 1], [], []>} : vector<2x576xbf16>, vector<576x64xbf16>, vector<2x64xf32> -> vector<2x64xf32>
    %c0_3 = arith.constant 0 : index
    %c0_4 = arith.constant 0 : index
    %4 = vector.load %arg3[%c0_3, %c0_4] : memref<1x64xf32, #tpu.memory_space<vmem>>, vector<1x64xf32>
    %5 = vector.broadcast %4 : vector<1x64xf32> to vector<2x64xf32>
    %6 = arith.addf %3, %5 : vector<2x64xf32>
    %cst_5 = arith.constant 0.000000e+00 : f32
    %7 = vector.broadcast %cst_5 : f32 to vector<2x64xf32>
    %8 = arith.maximumf %6, %7 : vector<2x64xf32>
    %c0_6 = arith.constant 0 : index
    %c0_7 = arith.constant 0 : index
    %9 = vector.load %arg4[%c0_6, %c0_7] : memref<2x64xf32, #tpu.memory_space<vmem>>, vector<2x64xf32>
    tpu.vector_store %arg4[%c0_6, %c0_7], %8 {strides = array<i32>} : memref<2x64xf32, #tpu.memory_space<vmem>>, vector<2x64xf32>,
    return
  }
  func.func @transform_0(%arg0: i32) -> (i32, i32) {
    %c0_i32 = arith.constant 0 : i32
    %c0_i32_0 = arith.constant 0 : i32
    return %arg0, %c0_i32 : i32, i32
  }
  func.func @transform_1(%arg0: i32) -> (i32, i32) {
    %c0_i32 = arith.constant 0 : i32
    %c0_i32_0 = arith.constant 0 : i32
    %c0_i32_1 = arith.constant 0 : i32
    return %c0_i32, %c0_i32_0 : i32, i32
  }
  func.func @transform_2(%arg0: i32) -> (i32, i32) {
    %c0_i32 = arith.constant 0 : i32
    %c0_i32_0 = arith.constant 0 : i32
    %c0_i32_1 = arith.constant 0 : i32
    return %c0_i32, %c0_i32_0 : i32, i32
  }
  func.func @transform_3(%arg0: i32) -> (i32, i32) {
    %c0_i32 = arith.constant 0 : i32
    %c0_i32_0 = arith.constant 0 : i32
    return %arg0, %c0_i32 : i32, i32
  }
}

module attributes {stable_mosaic.version = 11 : i64} {
  func.func @_mlp_heads_kernel(%arg0: i32, %arg1: memref<2x64xf32, #tpu.memory_space<vmem>>, %arg2: memref<64x512xbf16, #tpu.memory_space<vmem>>, %arg3: memref<1x512xf32, #tpu.memory_space<vmem>>, %arg4: memref<512x7xbf16, #tpu.memory_space<vmem>>, %arg5: memref<1x7xf32, #tpu.memory_space<vmem>>, %arg6: memref<2x7xf32, #tpu.memory_space<vmem>>) attributes {dimension_semantics = [#tpu.dimension_semantics<parallel>], iteration_bounds = array<i64: 1>, scalar_prefetch = 0 : i64, scratch_operands = 0 : i64, tpu.core_type = #tpu.core_type<tc>, window_params = [{transform_indices = @transform_0, window_bounds = array<i64: 2, 64>}, {pipeline_mode = #tpu.pipeline_mode<synchronous>, transform_indices = @transform_1, window_bounds = array<i64: 64, 512>}, {pipeline_mode = #tpu.pipeline_mode<synchronous>, transform_indices = @transform_2, window_bounds = array<i64: 1, 512>}, {pipeline_mode = #tpu.pipeline_mode<synchronous>, transform_indices = @transform_3, window_bounds = array<i64: 512, 7>}, {pipeline_mode = #tpu.pipeline_mode<synchronous>, transform_indices = @transform_4, window_bounds = array<i64: 1, 7>}, {transform_indices = @transform_5, window_bounds = array<i64: 2, 7>}]} {
    %c0 = arith.constant 0 : index
    %c0_0 = arith.constant 0 : index
    %0 = vector.load %arg1[%c0, %c0_0] : memref<2x64xf32, #tpu.memory_space<vmem>>, vector<2x64xf32>
    %1 = arith.truncf %0 : vector<2x64xf32> to vector<2x64xbf16>
    %c0_1 = arith.constant 0 : index
    %c0_2 = arith.constant 0 : index
    %2 = vector.load %arg2[%c0_1, %c0_2] : memref<64x512xbf16, #tpu.memory_space<vmem>>, vector<64x512xbf16>
    %cst = arith.constant dense<0.000000e+00> : vector<2x512xf32>
    %3 = tpu.matmul %1, %2, %cst {dimension_numbers = #tpu.dot_dimension_numbers<[1], [0], [0], [1], [0, 0, 1, 1], [], []>} : vector<2x64xbf16>, vector<64x512xbf16>, vector<2x512xf32> -> vector<2x512xf32>
    %c0_3 = arith.constant 0 : index
    %c0_4 = arith.constant 0 : index
    %4 = vector.load %arg3[%c0_3, %c0_4] : memref<1x512xf32, #tpu.memory_space<vmem>>, vector<1x512xf32>
    %5 = vector.broadcast %4 : vector<1x512xf32> to vector<2x512xf32>
    %6 = arith.addf %3, %5 : vector<2x512xf32>
    %cst_5 = arith.constant 0.000000e+00 : f32
    %7 = vector.broadcast %cst_5 : f32 to vector<2x512xf32>
    %8 = arith.maximumf %6, %7 : vector<2x512xf32>
    %9 = arith.truncf %8 : vector<2x512xf32> to vector<2x512xbf16>
    %c0_6 = arith.constant 0 : index
    %c0_7 = arith.constant 0 : index
    %10 = vector.load %arg4[%c0_6, %c0_7] : memref<512x7xbf16, #tpu.memory_space<vmem>>, vector<512x7xbf16>
    %cst_8 = arith.constant dense<0.000000e+00> : vector<2x7xf32>
    %11 = tpu.matmul %9, %10, %cst_8 {dimension_numbers = #tpu.dot_dimension_numbers<[1], [0], [0], [1], [0, 0, 1, 1], [], []>} : vector<2x512xbf16>, vector<512x7xbf16>, vector<2x7xf32> -> vector<2x7xf32>
    %c0_9 = arith.constant 0 : index
    %c0_10 = arith.constant 0 : index
    %12 = vector.load %arg5[%c0_9, %c0_10] : memref<1x7xf32, #tpu.memory_space<vmem>>, vector<1x7xf32>
    %13 = vector.broadcast %12 : vector<1x7xf32> to vector<2x7xf32>
    %14 = arith.addf %11, %13 : vector<2x7xf32>
    %c0_11 = arith.constant 0 : index
    %c0_12 = arith.constant 0 : index
    %15 = vector.load %arg6[%c0_11, %c0_12] : memref<2x7xf32, #tpu.memory_space<vmem>>, vector<2x7xf32>
    tpu.vector_store %arg6[%c0_11, %c0_12], %14 {strides = array<i32>} : memref<2x7xf32, #tpu.memory_space<vmem>>, vector<2x7xf32>,
    return
  }
  func.func @transform_0(%arg0: i32) -> (i32, i32) {
    %c0_i32 = arith.constant 0 : i32
    %c0_i32_0 = arith.constant 0 : i32
    return %arg0, %c0_i32 : i32, i32
  }
  func.func @transform_1(%arg0: i32) -> (i32, i32) {
    %c0_i32 = arith.constant 0 : i32
    %c0_i32_0 = arith.constant 0 : i32
    %c0_i32_1 = arith.constant 0 : i32
    return %c0_i32, %c0_i32_0 : i32, i32
  }
  func.func @transform_2(%arg0: i32) -> (i32, i32) {
    %c0_i32 = arith.constant 0 : i32
    %c0_i32_0 = arith.constant 0 : i32
    %c0_i32_1 = arith.constant 0 : i32
    return %c0_i32, %c0_i32_0 : i32, i32
  }
  func.func @transform_3(%arg0: i32) -> (i32, i32) {
    %c0_i32 = arith.constant 0 : i32
    %c0_i32_0 = arith.constant 0 : i32
    %c0_i32_1 = arith.constant 0 : i32
    return %c0_i32, %c0_i32_0 : i32, i32
  }
  func.func @transform_4(%arg0: i32) -> (i32, i32) {
    %c0_i32 = arith.constant 0 : i32
    %c0_i32_0 = arith.constant 0 : i32
    %c0_i32_1 = arith.constant 0 : i32
    return %c0_i32, %c0_i32_0 : i32, i32
  }
  func.func @transform_5(%arg0: i32) -> (i32, i32) {
    %c0_i32 = arith.constant 0 : i32
    %c0_i32_0 = arith.constant 0 : i32
    return %arg0, %c0_i32 : i32, i32
  }
}

</mosaic_0001>

<bundles_post_ra>
// kernel: dueling_dqn_forward.4
= control target key start
LH: loop header
LB: loop body
LE: loop exit
PB: predicated region body
PF: predicated region fallthrough
CT: control target
= control target key end

     0   :  { %vm311_vm0 = vcmask 261120   ;;  %s694_s1 = inlined_call_operand.vmem [shape: bf16[256,32], index: 1, kind: input, shape index: {}]   ;;  %s695_s0 = inlined_call_operand.vmem [shape: f32[128,256], index: 0, kind: input, shape index: {}]   ;;  %s696_s2 = inlined_call_operand.vmem [shape: f32[1,32], index: 2, kind: input, shape index: {}]   ;;  %s697_s3 = inlined_call_operand.vmem [shape: f32[128,32], index: 3, kind: output, shape index: {}]  }
   0x1   :  { %v429_v0 = vld [vmem:[%s694_s1 + $0x40] sm:$0xff]   ;;  %v431_v2 = vld [vmem:[%s694_s1 + $0x48] sm:$0xff]   ;;  %v433_v4 = vld [vmem:[%s694_s1 + $0x50] sm:$0xff]  }
   0x2   :  { %v430_v1 = vld [vmem:[%s694_s1] sm:$0xff]   ;;  %349 = vmatprep.subr.bf16.mxu0 %v429_v0  ;;  %413 = vmatprep.subr.bf16.mxu1 %v429_v0  ;;  %v432_v3 = vld [vmem:[%s694_s1 + $0x8] sm:$0xff]   ;;  %v434_v5 = vld [vmem:[%s694_s1 + $0x10] sm:$0xff]  }
   0x3   :  { %350 = vmatpush3.bf16.msra.mxu0 %v430_v1  ;;  %421 = vmatpush3.bf16.msra.mxu1 %v430_v1  ;;  %v435_v6 = vld [vmem:[%s694_s1 + $0x58] sm:$0xff]   ;;  %v437_v8 = vld [vmem:[%s694_s1 + $0x60] sm:$0xff]   ;;  %v439_v10 = vld [vmem:[%s694_s1 + $0x68] sm:$0xff]  }
   0x4   :  { %351 = vmatprep.subr.bf16.mxu0 %v431_v2  ;;  %414 = vmatprep.subr.bf16.mxu1 %v431_v2  ;;  %v436_v7 = vld [vmem:[%s694_s1 + $0x18] sm:$0xff]   ;;  %v438_v9 = vld [vmem:[%s694_s1 + $0x20] sm:$0xff]   ;;  %v16_v11 = vld [vmem:[%s695_s0 + $0x8] sm:$0xff] }
   0x5   :  { %v18_v12 = vld [vmem:[%s695_s0 + $0x18] sm:$0xff]  ;;  %v32_v13 = vld [vmem:[%s695_s0 + $0x88] sm:$0xff]  ;;  %v441_v18 = vld [vmem:[%s694_s1 + $0x70] sm:$0xff]  }
   0x6   :  { %v48_v14 = vpack.c.bf16 %v18_v12, %v16_v11  ;;  %v34_v15 = vld [vmem:[%s695_s0 + $0x98] sm:$0xff]  ;;  %v440_v17 = vld [vmem:[%s694_s1 + $0x28] sm:$0xff]   ;;  %v442_v19 = vld [vmem:[%s694_s1 + $0x30] sm:$0xff]  }
   0x7   :  { %352 = vmatpush3.bf16.msra.mxu0 %v432_v3  ;;  %422 = vmatpush3.bf16.msra.mxu1 %v432_v3  ;;  %v56_v16 = vpack.c.bf16 %v34_v15, %v32_v13  ;;  %v443_v20 = vld [vmem:[%s694_s1 + $0x78] sm:$0xff]   ;;  %v15_v22 = vld [vmem:[%s695_s0] sm:$0xff]  ;;  %v17_v23 = vld [vmem:[%s695_s0 + $0x10] sm:$0xff] }
   0x8   :  { %353 = vmatprep.subr.bf16.mxu0 %v433_v4  ;;  %415 = vmatprep.subr.bf16.mxu1 %v433_v4  ;;  %v444_v21 = vld [vmem:[%s694_s1 + $0x38] sm:$0xff]   ;;  %v31_v24 = vld [vmem:[%s695_s0 + $0x80] sm:$0xff]  ;;  %v33_v25 = vld [vmem:[%s695_s0 + $0x90] sm:$0xff]  ;;  %v47_v30 = vpack.c.bf16 %v17_v23, %v15_v22 }
   0x9   :  { %230 = vmatprep.mubr.bf16.mxu0 %v48_v14  ;;  %262 = vmatprep.mubr.bf16.mxu1 %v56_v16  ;;  %v20_v26 = vld [vmem:[%s695_s0 + $0x28] sm:$0xff]  ;;  %v22_v27 = vld [vmem:[%s695_s0 + $0x38] sm:$0xff]  ;;  %v55_v31 = vpack.c.bf16 %v33_v25, %v31_v24  ;;  %v19_v34 = vld [vmem:[%s695_s0 + $0x20] sm:$0xff] }
   0xa   :  { %v36_v28 = vld [vmem:[%s695_s0 + $0xa8] sm:$0xff]  ;;  %v38_v29 = vld [vmem:[%s695_s0 + $0xb8] sm:$0xff]  ;;  %v50_v32 = vpack.c.bf16 %v22_v27, %v20_v26  ;;  %v21_v35 = vld [vmem:[%s695_s0 + $0x30] sm:$0xff] }
   0xb   :  { %354 = vmatpush3.bf16.msra.mxu0 %v434_v5  ;;  %423 = vmatpush3.bf16.msra.mxu1 %v434_v5  ;;  %v58_v33 = vpack.c.bf16 %v38_v29, %v36_v28  ;;  %v35_v36 = vld [vmem:[%s695_s0 + $0xa0] sm:$0xff]  ;;  %v37_v37 = vld [vmem:[%s695_s0 + $0xb0] sm:$0xff]  ;;  %v24_v38 = vld [vmem:[%s695_s0 + $0x48] sm:$0xff]  ;;  %v49_v42 = vpack.c.bf16 %v21_v35, %v19_v34 }
   0xc   :  { %355 = vmatprep.subr.bf16.mxu0 %v435_v6  ;;  %416 = vmatprep.subr.bf16.mxu1 %v435_v6  ;;  %v26_v39 = vld [vmem:[%s695_s0 + $0x58] sm:$0xff]  ;;  %v40_v40 = vld [vmem:[%s695_s0 + $0xc8] sm:$0xff]  ;;  %v57_v43 = vpack.c.bf16 %v37_v37, %v35_v36  ;;  %v23_v46 = vld [vmem:[%s695_s0 + $0x40] sm:$0xff] }
   0xd   :  { %v42_v41 = vld [vmem:[%s695_s0 + $0xd8] sm:$0xff]  ;;  %v52_v44 = vpack.c.bf16 %v26_v39, %v24_v38  ;;  %v25_v47 = vld [vmem:[%s695_s0 + $0x50] sm:$0xff]  ;;  %v39_v48 = vld [vmem:[%s695_s0 + $0xc0] sm:$0xff] }
   0xe   :  { %v60_v45 = vpack.c.bf16 %v42_v41, %v40_v40  ;;  %v41_v49 = vld [vmem:[%s695_s0 + $0xd0] sm:$0xff]  ;;  %v28_v50 = vld [vmem:[%s695_s0 + $0x68] sm:$0xff]  ;;  %v30_v51 = vld [vmem:[%s695_s0 + $0x78] sm:$0xff]  ;;  %v51_v54 = vpack.c.bf16 %v25_v47, %v23_v46 }
   0xf   :  { %356 = vmatpush3.bf16.msra.mxu0 %v436_v7  ;;  %424 = vmatpush3.bf16.msra.mxu1 %v436_v7  ;;  %v44_v52 = vld [vmem:[%s695_s0 + $0xe8] sm:$0xff]  ;;  %v46_v53 = vld [vmem:[%s695_s0 + $0xf8] sm:$0xff]  ;;  %v59_v55 = vpack.c.bf16 %v41_v49, %v39_v48  ;;  %v54_v56 = vpack.c.bf16 %v30_v51, %v28_v50  ;;  %v27_v58 = vld [vmem:[%s695_s0 + $0x60] sm:$0xff] }
  0x10   :  { %357 = vmatprep.subr.bf16.mxu0 %v437_v8  ;;  %417 = vmatprep.subr.bf16.mxu1 %v437_v8  ;;  %v62_v57 = vpack.c.bf16 %v46_v53, %v44_v52  ;;  %v29_v59 = vld [vmem:[%s695_s0 + $0x70] sm:$0xff]  ;;  %v43_v60 = vld [vmem:[%s695_s0 + $0xe0] sm:$0xff] }
  0x11   :  { %v45_v61 = vld [vmem:[%s695_s0 + $0xf0] sm:$0xff]  ;;  %v53_v62 = vpack.c.bf16 %v29_v59, %v27_v58  ;;  %v612_v2 = vld [vmem:[%s696_s2] ss:$0 sm:$0xff] }
  0x12   :  { %v61_v63 = vpack.c.bf16 %v45_v61, %v43_v60 }
  0x13   :  { %358 = vmatpush3.bf16.msra.mxu0 %v438_v9  ;;  %425 = vmatpush3.bf16.msra.mxu1 %v438_v9 }
  0x14   :  { %359 = vmatprep.subr.bf16.mxu0 %v439_v10  ;;  %418 = vmatprep.subr.bf16.mxu1 %v439_v10 }
  0x17   :  { %360 = vmatpush3.bf16.msra.mxu0 %v440_v17  ;;  %426 = vmatpush3.bf16.msra.mxu1 %v440_v17 }
  0x18   :  { %361 = vmatprep.subr.bf16.mxu0 %v441_v18  ;;  %419 = vmatprep.subr.bf16.mxu1 %v441_v18 }
  0x1b   :  { %362 = vmatpush3.bf16.msra.mxu0 %v442_v19  ;;  %427 = vmatpush3.bf16.msra.mxu1 %v442_v19 }
  0x1c   :  { %363 = vmatprep.subr.bf16.mxu0 %v443_v20  ;;  %420 = vmatprep.subr.bf16.mxu1 %v443_v20 }
  0x1f   :  { %364 = vmatpush3.bf16.msra.mxu0 %v444_v21  ;;  %428 = vmatpush3.bf16.msra.mxu1 %v444_v21 }
  0x22   :  { %231 = vmatmul.mubr.bf16.vlgmr.msra.gmra.mrb[0].mxu0 %v47_v30  ;;  %263 = vmatmul.mubr.bf16.vlgmr.msra.gmra.mrb[0].mxu1 %v55_v31 }
  0x23   :  { %238 = vmatprep.mubr.bf16.mxu0 %v50_v32  ;;  %270 = vmatprep.mubr.bf16.mxu1 %v58_v33 }
  0x2a   :  { %239 = vmatmul.mubr.bf16.gmra.mrb[4].mxu0 %v49_v42  ;;  %271 = vmatmul.mubr.bf16.gmra.mrb[4].mxu1 %v57_v43 }
  0x2b   :  { %246 = vmatprep.mubr.bf16.mxu0 %v52_v44  ;;  %278 = vmatprep.mubr.bf16.mxu1 %v60_v45 }
  0x32   :  { %247 = vmatmul.mubr.bf16.gmra.mrb[8].mxu0 %v51_v54  ;;  %279 = vmatmul.mubr.bf16.gmra.mrb[8].mxu1 %v59_v55 }
  0x33   :  { %254 = vmatprep.mubr.bf16.mxu0 %v54_v56  ;;  %286 = vmatprep.mubr.bf16.mxu1 %v62_v57 }
  0x3a   :  { %255 = vmatmul.mubr.bf16.gmra.mrb[12].mxu0 %v53_v62  ;;  %287 = vmatmul.mubr.bf16.gmra.mrb[12].mxu1 %v61_v63 }
  0xf5   :  { %v365_v0 = vpop.f32.mrb[0].mxu0  ;;  %v389_v1 = vpop.f32.mrb[0].mxu1 }
  0xf6   :  { %v366_v3 = vpop.f32.mrb[1].mxu0  ;;  %v390_v4 = vpop.f32.mrb[1].mxu1 }
  0xf7   :  { %v367_v5 = vadd.f32 %v366_v3, %v365_v0  ;;  %v391_v6 = vadd.f32 %v390_v4, %v389_v1  ;;  %v368_v7 = vpop.f32.mrb[2].mxu0  ;;  %v392_v8 = vpop.f32.mrb[2].mxu1 }
  0xf8   :  { %v369_v9 = vpop.f32.mrb[3].mxu0  ;;  %v393_v10 = vpop.f32.mrb[3].mxu1 }
  0xf9   :  { %v233_v11 = vadd.f32 %v367_v5, %v612_v2  ;;  %v265_v12 = vadd.f32 %v391_v6, %v612_v2  ;;  %v370_v13 = vadd.f32 %v369_v9, %v368_v7  ;;  %v394_v14 = vadd.f32 %v393_v10, %v392_v8 }
  0xfb   :  { %v295_v15 = vmax.f32 %v233_v11, 0.0  ;;  %v303_v16 = vmax.f32 %v265_v12, 0.0  ;;  %v236_v17 = vadd.f32 %v370_v13, %v612_v2  ;;  %v268_v18 = vadd.f32 %v394_v14, %v612_v2 }
  0xfd   :  { %312 = vst.msk [vmem:[%s697_s3] sm:$0xff] %vm311_vm0, %v295_v15  ;;  %320 = vst.msk [vmem:[%s697_s3 + $0x40] sm:$0xff] %vm311_vm0, %v303_v16  ;;  %v296_v19 = vmax.f32 %v236_v17, 0.0  ;;  %v304_v20 = vmax.f32 %v268_v18, 0.0  ;;  %v371_v21 = vpop.f32.mrb[4].mxu0  ;;  %v395_v22 = vpop.f32.mrb[4].mxu1 }
  0xfe   :  { %v372_v23 = vpop.f32.mrb[5].mxu0  ;;  %v396_v24 = vpop.f32.mrb[5].mxu1 }
  0xff   :  { %313 = vst.msk [vmem:[%s697_s3 + $0x8] sm:$0xff] %vm311_vm0, %v296_v19  ;;  %321 = vst.msk [vmem:[%s697_s3 + $0x48] sm:$0xff] %vm311_vm0, %v304_v20  ;;  %v373_v25 = vadd.f32 %v372_v23, %v371_v21  ;;  %v397_v26 = vadd.f32 %v396_v24, %v395_v22  ;;  %v374_v27 = vpop.f32.mrb[6].mxu0  ;;  %v398_v28 = vpop.f32.mrb[6].mxu1 }
 0x100   :  { %v375_v29 = vpop.f32.mrb[7].mxu0  ;;  %v399_v30 = vpop.f32.mrb[7].mxu1 }
 0x101   :  { %v241_v31 = vadd.f32 %v373_v25, %v612_v2  ;;  %v273_v32 = vadd.f32 %v397_v26, %v612_v2  ;;  %v376_v33 = vadd.f32 %v375_v29, %v374_v27  ;;  %v400_v34 = vadd.f32 %v399_v30, %v398_v28 }
 0x103   :  { %v297_v35 = vmax.f32 %v241_v31, 0.0  ;;  %v305_v36 = vmax.f32 %v273_v32, 0.0  ;;  %v244_v37 = vadd.f32 %v376_v33, %v612_v2  ;;  %v276_v38 = vadd.f32 %v400_v34, %v612_v2 }
 0x105   :  { %314 = vst.msk [vmem:[%s697_s3 + $0x10] sm:$0xff] %vm311_vm0, %v297_v35  ;;  %322 = vst.msk [vmem:[%s697_s3 + $0x50] sm:$0xff] %vm311_vm0, %v305_v36  ;;  %v298_v39 = vmax.f32 %v244_v37, 0.0  ;;  %v306_v40 = vmax.f32 %v276_v38, 0.0  ;;  %v377_v41 = vpop.f32.mrb[8].mxu0  ;;  %v401_v42 = vpop.f32.mrb[8].mxu1 }
 0x106   :  { %v378_v43 = vpop.f32.mrb[9].mxu0  ;;  %v402_v44 = vpop.f32.mrb[9].mxu1 }
 0x107   :  { %315 = vst.msk [vmem:[%s697_s3 + $0x18] sm:$0xff] %vm311_vm0, %v298_v39  ;;  %323 = vst.msk [vmem:[%s697_s3 + $0x58] sm:$0xff] %vm311_vm0, %v306_v40  ;;  %v379_v45 = vadd.f32 %v378_v43, %v377_v41  ;;  %v403_v46 = vadd.f32 %v402_v44, %v401_v42  ;;  %v380_v47 = vpop.f32.mrb[10].mxu0  ;;  %v404_v48 = vpop.f32.mrb[10].mxu1 }
 0x108   :  { %v381_v49 = vpop.f32.mrb[11].mxu0  ;;  %v405_v50 = vpop.f32.mrb[11].mxu1 }
 0x109   :  { %v249_v51 = vadd.f32 %v379_v45, %v612_v2  ;;  %v281_v52 = vadd.f32 %v403_v46, %v612_v2  ;;  %v382_v53 = vadd.f32 %v381_v49, %v380_v47  ;;  %v406_v54 = vadd.f32 %v405_v50, %v404_v48 }
 0x10b   :  { %v299_v55 = vmax.f32 %v249_v51, 0.0  ;;  %v307_v56 = vmax.f32 %v281_v52, 0.0  ;;  %v252_v57 = vadd.f32 %v382_v53, %v612_v2  ;;  %v284_v58 = vadd.f32 %v406_v54, %v612_v2 }
 0x10d   :  { %316 = vst.msk [vmem:[%s697_s3 + $0x20] sm:$0xff] %vm311_vm0, %v299_v55  ;;  %324 = vst.msk [vmem:[%s697_s3 + $0x60] sm:$0xff] %vm311_vm0, %v307_v56  ;;  %v300_v59 = vmax.f32 %v252_v57, 0.0  ;;  %v308_v60 = vmax.f32 %v284_v58, 0.0  ;;  %v383_v61 = vpop.f32.mrb[12].mxu0  ;;  %v407_v62 = vpop.f32.mrb[12].mxu1 }
 0x10e   :  { %v384_v63 = vpop.f32.mrb[13].mxu0  ;;  %v408_v0 = vpop.f32.mrb[13].mxu1 }
 0x10f   :  { %317 = vst.msk [vmem:[%s697_s3 + $0x28] sm:$0xff] %vm311_vm0, %v300_v59  ;;  %325 = vst.msk [vmem:[%s697_s3 + $0x68] sm:$0xff] %vm311_vm0, %v308_v60  ;;  %v385_v1 = vadd.f32 %v384_v63, %v383_v61  ;;  %v409_v3 = vadd.f32 %v408_v0, %v407_v62  ;;  %v386_v4 = vpop.f32.mrb[14].mxu0  ;;  %v410_v5 = vpop.f32.mrb[14].mxu1 }
 0x110   :  { %v387_v6 = vpop.f32.mrb[15].mxu0  ;;  %v411_v7 = vpop.f32.mrb[15].mxu1 }
 0x111   :  { %v257_v8 = vadd.f32 %v385_v1, %v612_v2  ;;  %v289_v9 = vadd.f32 %v409_v3, %v612_v2  ;;  %v388_v10 = vadd.f32 %v387_v6, %v386_v4  ;;  %v412_v11 = vadd.f32 %v411_v7, %v410_v5 }
 0x113   :  { %v301_v12 = vmax.f32 %v257_v8, 0.0  ;;  %v309_v13 = vmax.f32 %v289_v9, 0.0  ;;  %v260_v14 = vadd.f32 %v388_v10, %v612_v2  ;;  %v292_v15 = vadd.f32 %v412_v11, %v612_v2 }
 0x115   :  { %318 = vst.msk [vmem:[%s697_s3 + $0x30] sm:$0xff] %vm311_vm0, %v301_v12  ;;  %326 = vst.msk [vmem:[%s697_s3 + $0x70] sm:$0xff] %vm311_vm0, %v309_v13  ;;  %v302_v16 = vmax.f32 %v260_v14, 0.0  ;;  %v310_v17 = vmax.f32 %v292_v15, 0.0 }
 0x117   :  { %319 = vst.msk [vmem:[%s697_s3 + $0x38] sm:$0xff] %vm311_vm0, %v302_v16  ;;  %327 = vst.msk [vmem:[%s697_s3 + $0x78] sm:$0xff] %vm311_vm0, %v310_v17 }

// kernel: dueling_dqn_forward.5
= control target key start
LH: loop header
LB: loop body
LE: loop exit
PB: predicated region body
PF: predicated region fallthrough
CT: control target
= control target key end

     0   :  { %vm397_vm0 = vcmask 523264   ;;  %vm400_vm1 = vcmask 517120   ;;  %s691_s1 = inlined_call_operand.vmem [shape: bf16[512,64], index: 1, kind: input, shape index: {}]   ;;  %s692_s0 = inlined_call_operand.vmem [shape: f32[18,512], index: 0, kind: input, shape index: {}]   ;;  %s693_s2 = inlined_call_operand.vmem [shape: f32[1,64], index: 2, kind: input, shape index: {}]   ;;  %s694_s3 = inlined_call_operand.vmem [shape: f32[18,64], index: 3, kind: output, shape index: {}]  }
   0x1   :  { %v495_v0 = vld [vmem:[%s691_s1 + $0x40] sm:$0xff]   ;;  %v499_v4 = vld [vmem:[%s691_s1 + $0x48] sm:$0xff]   ;;  %v503_v8 = vld [vmem:[%s691_s1 + $0x50] sm:$0xff]  }
   0x2   :  { %v496_v1 = vld [vmem:[%s691_s1 + $0xc0] sm:$0xff]   ;;  %439 = vmatprep.subr.bf16.mxu0 %v495_v0  ;;  %v500_v5 = vld [vmem:[%s691_s1 + $0xc8] sm:$0xff]   ;;  %v504_v9 = vld [vmem:[%s691_s1 + $0xd0] sm:$0xff]  }
   0x3   :  { %v497_v2 = vld [vmem:[%s691_s1] sm:$0xff]   ;;  %467 = vmatprep.subr.bf16.mxu1 %v496_v1  ;;  %v501_v6 = vld [vmem:[%s691_s1 + $0x8] sm:$0xff]   ;;  %v505_v10 = vld [vmem:[%s691_s1 + $0x10] sm:$0xff]  }
   0x4   :  { %v498_v3 = vld [vmem:[%s691_s1 + $0x80] sm:$0xff]   ;;  %440 = vmatpush3.bf16.msra.mxu0 %v497_v2  ;;  %v502_v7 = vld [vmem:[%s691_s1 + $0x88] sm:$0xff]   ;;  %v506_v11 = vld [vmem:[%s691_s1 + $0x90] sm:$0xff]  }
   0x5   :  { %468 = vmatpush3.bf16.msra.mxu1 %v498_v3  ;;  %441 = vmatprep.subr.bf16.mxu0 %v499_v4  ;;  %v507_v12 = vld [vmem:[%s691_s1 + $0x58] sm:$0xff]   ;;  %v511_v16 = vld [vmem:[%s691_s1 + $0x60] sm:$0xff]   ;;  %v515_v20 = vld [vmem:[%s691_s1 + $0x68] sm:$0xff]  }
   0x6   :  { %469 = vmatprep.subr.bf16.mxu1 %v500_v5  ;;  %v508_v13 = vld [vmem:[%s691_s1 + $0xd8] sm:$0xff]   ;;  %v512_v17 = vld [vmem:[%s691_s1 + $0xe0] sm:$0xff]   ;;  %v516_v21 = vld [vmem:[%s691_s1 + $0xe8] sm:$0xff]  }
   0x7   :  { %v509_v14 = vld [vmem:[%s691_s1 + $0x18] sm:$0xff]   ;;  %v513_v18 = vld [vmem:[%s691_s1 + $0x20] sm:$0xff]   ;;  %v517_v22 = vld [vmem:[%s691_s1 + $0x28] sm:$0xff]  }
   0x8   :  { %442 = vmatpush3.bf16.msra.mxu0 %v501_v6  ;;  %v510_v15 = vld [vmem:[%s691_s1 + $0x98] sm:$0xff]   ;;  %v514_v19 = vld [vmem:[%s691_s1 + $0xa0] sm:$0xff]   ;;  %v518_v23 = vld [vmem:[%s691_s1 + $0xa8] sm:$0xff]  }
   0x9   :  { %470 = vmatpush3.bf16.msra.mxu1 %v502_v7  ;;  %443 = vmatprep.subr.bf16.mxu0 %v503_v8  ;;  %v519_v24 = vld [vmem:[%s691_s1 + $0x70] sm:$0xff]   ;;  %v523_v28 = vld [vmem:[%s691_s1 + $0x78] sm:$0xff]   ;;  %v16_v32 = vld [vmem:[%s692_s0 + $0x8] sm:$0xff] }
   0xa   :  { %471 = vmatprep.subr.bf16.mxu1 %v504_v9  ;;  %v520_v25 = vld [vmem:[%s691_s1 + $0xf0] sm:$0xff]   ;;  %v524_v29 = vld [vmem:[%s691_s1 + $0xf8] sm:$0xff]   ;;  %v20_v33 = vld [vmem:[%s692_s0 + $0x28] sm:$0xff] }
   0xb   :  { %v521_v26 = vld [vmem:[%s691_s1 + $0x30] sm:$0xff]   ;;  %v525_v30 = vld [vmem:[%s691_s1 + $0x38] sm:$0xff]   ;;  %v28_v35 = vpack.c.bf16 %v20_v33, %v16_v32  ;;  %v15_v37 = vld [vmem:[%s692_s0] sm:$0xff] }
   0xc   :  { %444 = vmatpush3.bf16.msra.mxu0 %v505_v10  ;;  %v522_v27 = vld [vmem:[%s691_s1 + $0xb0] sm:$0xff]   ;;  %v526_v31 = vld [vmem:[%s691_s1 + $0xb8] sm:$0xff]   ;;  %v19_v38 = vld [vmem:[%s692_s0 + $0x20] sm:$0xff] }
   0xd   :  { %472 = vmatpush3.bf16.msra.mxu1 %v506_v11  ;;  %445 = vmatprep.subr.bf16.mxu0 %v507_v12  ;;  %v18_v34 = vld [vmem:[%s692_s0 + $0x18] sm:$0xff]  ;;  %v27_v40 = vpack.c.bf16 %v19_v38, %v15_v37  ;;  %v17_v41 = vld [vmem:[%s692_s0 + $0x10] sm:$0xff]  ;;  %v24_v43 = vld [vmem:[%s692_s0 + $0x48] sm:$0x3] }
   0xe   :  { %473 = vmatprep.subr.bf16.mxu1 %v508_v13  ;;  %v22_v36 = vld [vmem:[%s692_s0 + $0x38] sm:$0xff]  ;;  %v21_v42 = vld [vmem:[%s692_s0 + $0x30] sm:$0xff]  ;;  %330 = vmatprep.mubr.bf16.mxu0 %v28_v35  ;;  %v32_v45 = vpack.c.bf16 %v24_v43, %v24_v43  ;;  %v23_v48 = vld [vmem:[%s692_s0 + $0x40] sm:$0x3] }
   0xf   :  { %v30_v39 = vpack.c.bf16 %v22_v36, %v18_v34  ;;  %v29_v44 = vpack.c.bf16 %v21_v42, %v17_v41  ;;  %v26_v46 = vld [vmem:[%s692_s0 + $0x58] sm:$0x3]  ;;  %v25_v49 = vld [vmem:[%s692_s0 + $0x50] sm:$0x3]  ;;  %v31_v50 = vpack.c.bf16 %v23_v48, %v23_v48  ;;  %v406_v54 = vld [vmem:[%s693_s2] ss:$0 sm:$0xff] }
  0x10   :  { %446 = vmatpush3.bf16.msra.mxu0 %v509_v14  ;;  %v34_v47 = vpack.c.bf16 %v26_v46, %v26_v46  ;;  %v33_v51 = vpack.c.bf16 %v25_v49, %v25_v49 }
  0x11   :  { %474 = vmatpush3.bf16.msra.mxu1 %v510_v15  ;;  %447 = vmatprep.subr.bf16.mxu0 %v511_v16 }
  0x12   :  { %475 = vmatprep.subr.bf16.mxu1 %v512_v17  ;;  %378 = vmatprep.mubr.bf16.mxu1 %v30_v39 }
  0x14   :  { %448 = vmatpush3.bf16.msra.mxu0 %v513_v18 }
  0x15   :  { %476 = vmatpush3.bf16.msra.mxu1 %v514_v19  ;;  %449 = vmatprep.subr.bf16.mxu0 %v515_v20 }
  0x16   :  { %477 = vmatprep.subr.bf16.mxu1 %v516_v21 }
  0x18   :  { %450 = vmatpush3.bf16.msra.mxu0 %v517_v22 }
  0x19   :  { %478 = vmatpush3.bf16.msra.mxu1 %v518_v23  ;;  %451 = vmatprep.subr.bf16.mxu0 %v519_v24 }
  0x1a   :  { %479 = vmatprep.subr.bf16.mxu1 %v520_v25 }
  0x1c   :  { %452 = vmatpush3.bf16.msra.mxu0 %v521_v26 }
  0x1d   :  { %480 = vmatpush3.bf16.msra.mxu1 %v522_v27  ;;  %453 = vmatprep.subr.bf16.mxu0 %v523_v28 }
  0x1e   :  { %481 = vmatprep.subr.bf16.mxu1 %v524_v29 }
  0x20   :  { %454 = vmatpush3.bf16.msra.mxu0 %v525_v30 }
  0x21   :  { %482 = vmatpush3.bf16.msra.mxu1 %v526_v31 }
  0x23   :  { %331 = vmatmul.mubr.bf16.vlgmr.msra.gmra.mrb[0].mxu0 %v27_v40 }
  0x24   :  { %379 = vmatmul.mubr.bf16.vlgmr.msra.gmra.mrb[0].mxu1 %v29_v44  ;;  %338 = vmatprep.mubr.bf16.mxu0 %v32_v45 }
  0x25   :  { %386 = vmatprep.mubr.bf16.mxu1 %v34_v47 }
  0x2b   :  { %339 = vmatmul.mubr.bf16.gmra.mrb[4].mxu0 %v31_v50 }
  0x2c   :  { %387 = vmatmul.mubr.bf16.gmra.mrb[4].mxu1 %v33_v51 }
  0xf6   :  { %v455_v52 = vpop.f32.mrb[0].mxu0 }
  0xf7   :  { %v483_v53 = vpop.f32.mrb[0].mxu1  ;;  %v456_v55 = vpop.f32.mrb[1].mxu0 }
  0xf8   :  { %v457_v56 = vadd.f32 %v456_v55, %v455_v52  ;;  %v484_v57 = vpop.f32.mrb[1].mxu1  ;;  %v458_v58 = vpop.f32.mrb[2].mxu0 }
  0xf9   :  { %v485_v59 = vadd.f32 %v484_v57, %v483_v53  ;;  %v486_v60 = vpop.f32.mrb[2].mxu1  ;;  %v459_v61 = vpop.f32.mrb[3].mxu0 }
  0xfa   :  { %v333_v62 = vadd.f32 %v457_v56, %v406_v54  ;;  %v460_v63 = vadd.f32 %v459_v61, %v458_v58  ;;  %v487_v0 = vpop.f32.mrb[3].mxu1 }
  0xfb   :  { %v488_v1 = vadd.f32 %v487_v0, %v486_v60 }
  0xfc   :  { %v381_v2 = vadd.f32 %v485_v59, %v333_v62  ;;  %v336_v3 = vadd.f32 %v460_v63, %v406_v54 }
  0xfe   :  { %v394_v4 = vmax.f32 %v381_v2, 0.0  ;;  %v384_v5 = vadd.f32 %v488_v1, %v336_v3  ;;  %v461_v6 = vpop.f32.mrb[4].mxu0 }
  0xff   :  { %v489_v7 = vpop.f32.mrb[4].mxu1  ;;  %v462_v8 = vpop.f32.mrb[5].mxu0 }
 0x100   :  { %398 = vst.msk [vmem:[%s694_s3] sm:$0xff] %vm397_vm0, %v394_v4  ;;  %v395_v9 = vmax.f32 %v384_v5, 0.0  ;;  %v463_v10 = vadd.f32 %v462_v8, %v461_v6  ;;  %v490_v11 = vpop.f32.mrb[5].mxu1  ;;  %v464_v12 = vpop.f32.mrb[6].mxu0 }
 0x101   :  { %v491_v13 = vadd.f32 %v490_v11, %v489_v7  ;;  %v492_v14 = vpop.f32.mrb[6].mxu1  ;;  %v465_v15 = vpop.f32.mrb[7].mxu0 }
 0x102   :  { %399 = vst.msk [vmem:[%s694_s3 + $0x8] sm:$0xff] %vm397_vm0, %v395_v9  ;;  %v341_v16 = vadd.f32 %v463_v10, %v406_v54  ;;  %v493_v17 = vpop.f32.mrb[7].mxu1 }
 0x104   :  { %v389_v18 = vadd.f32 %v491_v13, %v341_v16 }
 0x106   :  { %v396_v19 = vmax.f32 %v389_v18, 0.0 }
 0x108   :  { %401 = vst.msk [vmem:[%s694_s3 + $0x10] sm:$0x3] %vm400_vm1, %v396_v19 }

// kernel: dueling_dqn_forward.6
= control target key start
LH: loop header
LB: loop body
LE: loop exit
PB: predicated region body
PF: predicated region fallthrough
CT: control target
= control target key end

     0   :  { %v619_v21 = vmov 1983009808   ;;  %v23_v23 = vlaneseq  ;;  %v620_v40 = vmov 0.0   ;;  %vm621_vm0 = vmmov 0   ;;  %s762_s1 = inlined_call_operand.vmem [shape: bf16[576,64], index: 1, kind: input, shape index: {}]   ;;  %s763_s0 = inlined_call_operand.vmem [shape: f32[2,576], index: 0, kind: input, shape index: {}]   ;;  %s764_s2 = inlined_call_operand.vmem [shape: f32[1,64], index: 2, kind: input, shape index: {}]   ;;  %s765_s3 = inlined_call_operand.vmem [shape: f32[2,64], index: 3, kind: output, shape index: {}]  }
   0x1   :  { %v582_v0 = vld [vmem:[%s762_s1 + $0x40] sm:$0xff]   ;;  %v586_v4 = vld [vmem:[%s762_s1 + $0x48] sm:$0xff]   ;;  %v590_v8 = vld [vmem:[%s762_s1 + $0x50] sm:$0xff]   ;;  %v21_v22 = vunpack.c.l.s4 %v619_v21  ;;  %vm348_vm1 = vcmask 523264   ;;  %vm473_vm2 = vcmask 517120  }
   0x2   :  { %v583_v1 = vld [vmem:[%s762_s1] sm:$0xff]   ;;  %518 = vmatprep.subr.bf16.mxu0 %v582_v0  ;;  %v587_v5 = vld [vmem:[%s762_s1 + $0x8] sm:$0xff]   ;;  %v591_v9 = vld [vmem:[%s762_s1 + $0x10] sm:$0xff]   ;;  %v24_v29 = vshrl.u32 %v23_v23, 7 }
   0x3   :  { %v584_v2 = vld [vmem:[%s762_s1 + $0xc0] sm:$0xff]   ;;  %519 = vmatpush3.bf16.msra.mxu0 %v583_v1  ;;  %v588_v6 = vld [vmem:[%s762_s1 + $0xc8] sm:$0xff]   ;;  %v592_v10 = vld [vmem:[%s762_s1 + $0xd0] sm:$0xff]   ;;  %v22_v28 = vunpack.c.0.s8 %v21_v22 }
   0x4   :  { %v585_v3 = vld [vmem:[%s762_s1 + $0x80] sm:$0xff]   ;;  %540 = vmatprep.subr.bf16.mxu1 %v584_v2  ;;  %520 = vmatprep.subr.bf16.mxu0 %v586_v4  ;;  %v589_v7 = vld [vmem:[%s762_s1 + $0x88] sm:$0xff]   ;;  %v593_v11 = vld [vmem:[%s762_s1 + $0x90] sm:$0xff]  }
   0x5   :  { %541 = vmatpush3.bf16.msra.mxu1 %v585_v3  ;;  %v594_v12 = vld [vmem:[%s762_s1 + $0x58] sm:$0xff]   ;;  %v598_v16 = vld [vmem:[%s762_s1 + $0x60] sm:$0xff]   ;;  %v602_v20 = vld [vmem:[%s762_s1 + $0x68] sm:$0xff]   ;;  %v25_v34 = vsub.s32 %v22_v28, %v24_v29 }
   0x6   :  { %542 = vmatprep.subr.bf16.mxu1 %v588_v6  ;;  %v595_v13 = vld [vmem:[%s762_s1 + $0x18] sm:$0xff]   ;;  %v599_v17 = vld [vmem:[%s762_s1 + $0x20] sm:$0xff]   ;;  %v603_v24 = vld [vmem:[%s762_s1 + $0x28] sm:$0xff]  }
   0x7   :  { %521 = vmatpush3.bf16.msra.mxu0 %v587_v5  ;;  %v596_v14 = vld [vmem:[%s762_s1 + $0xd8] sm:$0xff]   ;;  %v600_v18 = vld [vmem:[%s762_s1 + $0xe0] sm:$0xff]   ;;  %v604_v25 = vld [vmem:[%s762_s1 + $0xe8] sm:$0xff]  }
   0x8   :  { %522 = vmatprep.subr.bf16.mxu0 %v590_v8  ;;  %v597_v15 = vld [vmem:[%s762_s1 + $0x98] sm:$0xff]   ;;  %v601_v19 = vld [vmem:[%s762_s1 + $0xa0] sm:$0xff]   ;;  %v605_v26 = vld [vmem:[%s762_s1 + $0xa8] sm:$0xff]  }
   0x9   :  { %543 = vmatpush3.bf16.msra.mxu1 %v589_v7  ;;  %v606_v27 = vld [vmem:[%s762_s1 + $0x70] sm:$0xff]   ;;  %v610_v33 = vld [vmem:[%s762_s1 + $0x78] sm:$0xff]   ;;  %v15_v37 = vld [vmem:[%s763_s0] sm:$0xff] }
   0xa   :  { %544 = vmatprep.subr.bf16.mxu1 %v592_v10  ;;  %v607_v30 = vld [vmem:[%s762_s1 + $0x30] sm:$0xff]   ;;  %v611_v35 = vld [vmem:[%s762_s1 + $0x38] sm:$0xff]   ;;  %v26_v39 = vrot.slane %v15_v37, %v25_v34  ;;  %v19_v41 = vcombine.high %v15_v37, %v15_v37  ;;  %v615_v47 = vld [vmem:[%s762_s1 + $0x100] sm:$0xff]  }
   0xb   :  { %523 = vmatpush3.bf16.msra.mxu0 %v591_v9  ;;  %v608_v31 = vld [vmem:[%s762_s1 + $0xf0] sm:$0xff]   ;;  %v612_v36 = vld [vmem:[%s762_s1 + $0xf8] sm:$0xff]   ;;  %v616_v50 = vld [vmem:[%s762_s1 + $0x108] sm:$0xff]  }
   0xc   :  { %524 = vmatprep.subr.bf16.mxu0 %v594_v12  ;;  %v609_v32 = vld [vmem:[%s762_s1 + $0xb0] sm:$0xff]   ;;  %v613_v38 = vld [vmem:[%s762_s1 + $0xb8] sm:$0xff]   ;;  %v34_v42 = vcombine.high %v26_v39, %v26_v39  ;;  %v33_v43 = vrot.slane %v19_v41, %v25_v34  ;;  %v48_v44 = vpack.c.bf16 %v26_v39, %v26_v39  ;;  %v479_v52 = vld.sshfl [vmem:[%s763_s0 + $0x8] sm:$0x3 pattern:$0x76325410] }
   0xd   :  { %545 = vmatpush3.bf16.msra.mxu1 %v593_v11  ;;  %v617_v51 = vld [vmem:[%s762_s1 + $0x110] sm:$0xff]   ;;  %v618_v53 = vld [vmem:[%s762_s1 + $0x118] sm:$0xff]   ;;  %v52_v54 = vpack.c.bf16 %v479_v52, %v479_v52  ;;  %v480_v56 = vld [vmem:[%s764_s2] ss:$0 sm:$0xff] }
   0xe   :  { %546 = vmatprep.subr.bf16.mxu1 %v596_v14  ;;  %v49_v45 = vpack.c.bf16 %v34_v42, %v34_v42  ;;  %v35_v46 = vcombine.high %v33_v43, %v33_v43  ;;  %v50_v48 = vpack.c.bf16 %v33_v43, %v33_v43 }
   0xf   :  { %525 = vmatpush3.bf16.msra.mxu0 %v595_v13 }
  0x10   :  { %526 = vmatprep.subr.bf16.mxu0 %v598_v16  ;;  %384 = vmatprep.mubr.bf16.mxu0 %v49_v45  ;;  %v51_v49 = vpack.c.bf16 %v35_v46, %v35_v46 }
  0x11   :  { %547 = vmatpush3.bf16.msra.mxu1 %v597_v15 }
  0x12   :  { %548 = vmatprep.subr.bf16.mxu1 %v600_v18  ;;  %424 = vmatprep.mubr.bf16.mxu1 %v51_v49 }
  0x13   :  { %527 = vmatpush3.bf16.msra.mxu0 %v599_v17 }
  0x14   :  { %528 = vmatprep.subr.bf16.mxu0 %v602_v20 }
  0x15   :  { %549 = vmatpush3.bf16.msra.mxu1 %v601_v19 }
  0x16   :  { %550 = vmatprep.subr.bf16.mxu1 %v604_v25 }
  0x17   :  { %529 = vmatpush3.bf16.msra.mxu0 %v603_v24 }
  0x18   :  { %530 = vmatprep.subr.bf16.mxu0 %v606_v27 }
  0x19   :  { %551 = vmatpush3.bf16.msra.mxu1 %v605_v26 }
  0x1a   :  { %552 = vmatprep.subr.bf16.mxu1 %v608_v31 }
  0x1b   :  { %531 = vmatpush3.bf16.msra.mxu0 %v607_v30 }
  0x1c   :  { %532 = vmatprep.subr.bf16.mxu0 %v610_v33 }
  0x1d   :  { %553 = vmatpush3.bf16.msra.mxu1 %v609_v32 }
  0x1e   :  { %554 = vmatprep.subr.bf16.mxu1 %v612_v36 }
  0x1f   :  { %533 = vmatpush3.bf16.msra.mxu0 %v611_v35 }
  0x20   :  { %567 = vmatprep.subr.bf16.mxu0 %v620_v40 }
  0x21   :  { %555 = vmatpush3.bf16.msra.mxu1 %v613_v38 }
  0x22   :  { %385 = vmatmul.mubr.bf16.vlgmr.msra.gmra.mrb[0].mxu0 %v48_v44 }
  0x23   :  { %568 = vmatpush3.bf16.msra.mxu0 %v615_v47  ;;  %575 = vmatprep.mubr.msk.bf16.mxu0 %vm621_vm0, %v620_v40 }
  0x24   :  { %425 = vmatmul.mubr.bf16.vlgmr.msra.gmra.mrb[0].mxu1 %v50_v48  ;;  %569 = vmatprep.subr.bf16.mxu0 %v620_v40 }
  0x27   :  { %570 = vmatpush3.bf16.msra.mxu0 %v616_v50 }
  0x28   :  { %571 = vmatprep.subr.bf16.mxu0 %v620_v40 }
  0x2b   :  { %572 = vmatpush3.bf16.msra.mxu0 %v617_v51 }
  0x2c   :  { %573 = vmatprep.subr.bf16.mxu0 %v620_v40 }
  0x2f   :  { %574 = vmatpush3.bf16.msra.mxu0 %v618_v53 }
  0x32   :  { %576 = vmatmul.mubr.msk.bf16.vlgmr.msra.gmra.mrb[4].mxu0 %vm348_vm1, %v52_v54 }
  0xf5   :  { %v534_v55 = vpop.f32.mrb[0].mxu0 }
  0xf6   :  { %v535_v57 = vpop.f32.mrb[1].mxu0 }
  0xf7   :  { %v536_v58 = vadd.f32 %v535_v57, %v534_v55  ;;  %v537_v59 = vpop.f32.mrb[2].mxu0  ;;  %v556_v60 = vpop.f32.mrb[0].mxu1 }
  0xf8   :  { %v538_v61 = vpop.f32.mrb[3].mxu0  ;;  %v557_v62 = vpop.f32.mrb[1].mxu1 }
  0xf9   :  { %v387_v63 = vadd.f32 %v536_v58, %v480_v56  ;;  %v558_v0 = vadd.f32 %v557_v62, %v556_v60  ;;  %v559_v1 = vpop.f32.mrb[2].mxu1 }
  0xfa   :  { %v560_v2 = vpop.f32.mrb[3].mxu1 }
  0xfb   :  { %v427_v3 = vadd.f32 %v558_v0, %v387_v63 }
 0x105   :  { %v466_v4 = vpop.f32.mrb[4].mxu0 }
 0x106   :  { %v467_v5 = vadd.f32 %v466_v4, %v427_v3  ;;  %v577_v6 = vpop.f32.mrb[5].mxu0 }
 0x107   :  { %v469_v7 = vpop.f32.mrb[6].mxu0 }
 0x108   :  { %v472_v8 = vmax.f32 %v467_v5, 0.0  ;;  %v578_v9 = vpop.f32.mrb[7].mxu0 }
 0x10a   :  { %474 = vst.msk [vmem:[%s765_s3] sm:$0x3] %vm473_vm2, %v472_v8 }

// kernel: dueling_dqn_forward.7
= control target key start
LH: loop header
LB: loop body
LE: loop exit
PB: predicated region body
PF: predicated region fallthrough
CT: control target
= control target key end

     0   :  { %v736_v1 = vmov 0   ;;  %vm141_vm0 = vcmask 523264   ;;  %v41_v51 = vlaneseq  ;;  %vm578_vm1 = vcmask 50176   ;;  %s923_s1 = inlined_call_operand.vmem [shape: bf16[64,512], index: 1, kind: input, shape index: {}]   ;;  %s924_s0 = inlined_call_operand.vmem [shape: f32[2,64], index: 0, kind: input, shape index: {}]   ;;  %s925_s3 = inlined_call_operand.vmem [shape: bf16[512,7], index: 3, kind: input, shape index: {}]   ;;  %s926_s2 = inlined_call_operand.vmem [shape: f32[1,512], index: 2, kind: input, shape index: {}]   ;;  %s927_s4 = inlined_call_operand.vmem [shape: f32[1,7], index: 4, kind: input, shape index: {}]   ;;  %s928_s5 = inlined_call_operand.vmem [shape: f32[2,7], index: 5, kind: output, shape index: {}]  }
   0x1   :  { %v680_v0 = vld [vmem:[%s923_s1 + $0x4] ss:$16 sps:$4 sm:$0xff]   ;;  %177 = vmatprep.mubr.bf16.mxu0 %v736_v1  ;;  %218 = vmatprep.mubr.bf16.mxu1 %v736_v1  ;;  %v682_v2 = vld [vmem:[%s923_s1 + $0xc] ss:$16 sps:$4 sm:$0xff]   ;;  %v684_v3 = vld [vmem:[%s923_s1] ss:$16 sps:$4 sm:$0xff]  }
   0x2   :  { %145 = vmatprep.subr.bf16.mxu0 %v680_v0  ;;  %v685_v4 = vld [vmem:[%s923_s1 + $0x8] ss:$16 sps:$4 sm:$0xff]   ;;  %186 = vmatprep.subr.bf16.mxu1 %v682_v2  ;;  %v686_v5 = vld [vmem:[%s923_s1 + $0x24] ss:$16 sps:$4 sm:$0xff]   ;;  %v688_v6 = vld [vmem:[%s923_s1 + $0x2c] ss:$16 sps:$4 sm:$0xff]  }
   0x3   :  { %146 = vmatpush1.bf16.msra.mxu0 %v684_v3  ;;  %187 = vmatpush1.bf16.msra.mxu1 %v685_v4  ;;  %v690_v7 = vld [vmem:[%s923_s1 + $0x20] ss:$16 sps:$4 sm:$0xff]   ;;  %v691_v8 = vld [vmem:[%s923_s1 + $0x28] ss:$16 sps:$4 sm:$0xff]   ;;  %v692_v9 = vld [vmem:[%s923_s1 + $0x44] ss:$16 sps:$4 sm:$0xff]  }
   0x4   :  { %147 = vmatprep.subr.bf16.mxu0 %v686_v5  ;;  %188 = vmatprep.subr.bf16.mxu1 %v688_v6  ;;  %v694_v10 = vld [vmem:[%s923_s1 + $0x4c] ss:$16 sps:$4 sm:$0xff]   ;;  %v696_v11 = vld [vmem:[%s923_s1 + $0x40] ss:$16 sps:$4 sm:$0xff]   ;;  %v697_v12 = vld [vmem:[%s923_s1 + $0x48] ss:$16 sps:$4 sm:$0xff]  }
   0x5   :  { %v698_v13 = vld [vmem:[%s923_s1 + $0x64] ss:$16 sps:$4 sm:$0xff]   ;;  %v700_v14 = vld [vmem:[%s923_s1 + $0x6c] ss:$16 sps:$4 sm:$0xff]   ;;  %v702_v15 = vld [vmem:[%s923_s1 + $0x60] ss:$16 sps:$4 sm:$0xff]  }
   0x6   :  { %v703_v16 = vld [vmem:[%s923_s1 + $0x68] ss:$16 sps:$4 sm:$0xff]   ;;  %v21_v17 = vld [vmem:[%s924_s0] sm:$0x3]  ;;  %v712_v27 = vld [vmem:[%s925_s3 + $0x50] sm:$0xff]   ;;  %v42_v52 = vshrl.u32 %v41_v51, 7 }
   0x7   :  { %148 = vmatpush1.bf16.msra.mxu0 %v690_v7  ;;  %189 = vmatpush1.bf16.msra.mxu1 %v691_v8  ;;  %v704_v18 = vld [vmem:[%s925_s3 + $0x40] sm:$0xff]   ;;  %v22_v21 = vpack.c.bf16 %v21_v17, %v21_v17  ;;  %v708_v23 = vld [vmem:[%s925_s3 + $0x48] sm:$0xff]   ;;  %v713_v28 = vld [vmem:[%s925_s3 + $0xd0] sm:$0xff]  }
   0x8   :  { %149 = vmatprep.subr.bf16.mxu0 %v692_v9  ;;  %190 = vmatprep.subr.bf16.mxu1 %v694_v10  ;;  %v705_v19 = vld [vmem:[%s925_s3 + $0xc0] sm:$0xff]   ;;  %v709_v24 = vld [vmem:[%s925_s3 + $0xc8] sm:$0xff]   ;;  %v714_v29 = vld [vmem:[%s925_s3 + $0x10] sm:$0xff]   ;;  %v43_v53 = vsub.s32 0, %v42_v52  ;;  %v51_v54 = vsub.s32 2, %v42_v52  ;;  %v47_v56 = vsub.s32 1, %v42_v52 }
   0x9   :  { %v706_v20 = vld [vmem:[%s925_s3] sm:$0xff]   ;;  %v710_v25 = vld [vmem:[%s925_s3 + $0x8] sm:$0xff]   ;;  %v715_v30 = vld [vmem:[%s925_s3 + $0x90] sm:$0xff]   ;;  %v55_v57 = vsub.s32 3, %v42_v52 }
   0xa   :  { %v707_v22 = vld [vmem:[%s925_s3 + $0x80] sm:$0xff]   ;;  %v711_v26 = vld [vmem:[%s925_s3 + $0x88] sm:$0xff]   ;;  %v716_v31 = vld [vmem:[%s925_s3 + $0x58] sm:$0xff]  }
   0xb   :  { %150 = vmatpush1.bf16.msra.mxu0 %v696_v11  ;;  %191 = vmatpush1.bf16.msra.mxu1 %v697_v12  ;;  %v717_v32 = vld [vmem:[%s925_s3 + $0xd8] sm:$0xff]   ;;  %v720_v35 = vld [vmem:[%s925_s3 + $0x60] sm:$0xff]   ;;  %v724_v39 = vld [vmem:[%s925_s3 + $0x68] sm:$0xff]  }
   0xc   :  { %151 = vmatprep.subr.bf16.mxu0 %v698_v13  ;;  %192 = vmatprep.subr.bf16.mxu1 %v700_v14  ;;  %v718_v33 = vld [vmem:[%s925_s3 + $0x18] sm:$0xff]   ;;  %v721_v36 = vld [vmem:[%s925_s3 + $0xe0] sm:$0xff]   ;;  %v725_v40 = vld [vmem:[%s925_s3 + $0xe8] sm:$0xff]  }
   0xd   :  { %v719_v34 = vld [vmem:[%s925_s3 + $0x98] sm:$0xff]   ;;  %v722_v37 = vld [vmem:[%s925_s3 + $0x20] sm:$0xff]   ;;  %v726_v41 = vld [vmem:[%s925_s3 + $0x28] sm:$0xff]  }
   0xe   :  { %v723_v38 = vld [vmem:[%s925_s3 + $0xa0] sm:$0xff]   ;;  %v727_v42 = vld [vmem:[%s925_s3 + $0xa8] sm:$0xff]   ;;  %v728_v43 = vld [vmem:[%s925_s3 + $0x70] sm:$0xff]  }
   0xf   :  { %152 = vmatpush1.bf16.msra.mxu0 %v702_v15  ;;  %193 = vmatpush1.bf16.msra.mxu1 %v703_v16  ;;  %v729_v44 = vld [vmem:[%s925_s3 + $0xf0] sm:$0xff]   ;;  %v732_v47 = vld [vmem:[%s925_s3 + $0x78] sm:$0xff]   ;;  %v39_v55 = vld [vmem:[%s926_s2] sm:$0xf] }
  0x10   :  { %635 = vmatprep.subr.bf16.mxu0 %v704_v18  ;;  %657 = vmatprep.subr.bf16.mxu1 %v705_v19  ;;  %v730_v45 = vld [vmem:[%s925_s3 + $0x30] sm:$0xff]   ;;  %v733_v48 = vld [vmem:[%s925_s3 + $0xf8] sm:$0xff]   ;;  %v44_v58 = vrot.slane %v39_v55, %v43_v53  ;;  %v52_v59 = vrot.slane %v39_v55, %v51_v54  ;;  %v48_v60 = vrot.slane %v39_v55, %v47_v56 }
  0x11   :  { %v731_v46 = vld [vmem:[%s925_s3 + $0xb0] sm:$0xff]   ;;  %v734_v49 = vld [vmem:[%s925_s3 + $0x38] sm:$0xff]   ;;  %v56_v61 = vrot.slane %v39_v55, %v55_v57 }
  0x12   :  { %600 = vmatmul.mubr.msk.bf16.vlgmr.msra.gmra.mrb[0].mxu0 %vm141_vm0, %v22_v21  ;;  %601 = vmatmul.mubr.msk.bf16.vlgmr.msra.gmra.mrb[0].mxu1 %vm141_vm0, %v22_v21  ;;  %v735_v50 = vld [vmem:[%s925_s3 + $0xb8] sm:$0xff]  }
  0x13   :  { %636 = vmatpush3.bf16.msra.mxu0 %v706_v20  ;;  %658 = vmatpush3.bf16.msra.mxu1 %v707_v22  ;;  %v602_v20 = vld [vmem:[%s927_s4] ss:$0 sm:$0xff] }
  0x14   :  { %637 = vmatprep.subr.bf16.mxu0 %v708_v23  ;;  %659 = vmatprep.subr.bf16.mxu1 %v709_v24 }
  0x17   :  { %638 = vmatpush3.bf16.msra.mxu0 %v710_v25  ;;  %660 = vmatpush3.bf16.msra.mxu1 %v711_v26 }
  0x18   :  { %639 = vmatprep.subr.bf16.mxu0 %v712_v27  ;;  %661 = vmatprep.subr.bf16.mxu1 %v713_v28 }
  0x1b   :  { %640 = vmatpush3.bf16.msra.mxu0 %v714_v29  ;;  %662 = vmatpush3.bf16.msra.mxu1 %v715_v30 }
  0x1c   :  { %641 = vmatprep.subr.bf16.mxu0 %v716_v31  ;;  %663 = vmatprep.subr.bf16.mxu1 %v717_v32 }
  0x1f   :  { %642 = vmatpush3.bf16.msra.mxu0 %v718_v33  ;;  %664 = vmatpush3.bf16.msra.mxu1 %v719_v34 }
  0x20   :  { %643 = vmatprep.subr.bf16.mxu0 %v720_v35  ;;  %665 = vmatprep.subr.bf16.mxu1 %v721_v36 }
  0x23   :  { %644 = vmatpush3.bf16.msra.mxu0 %v722_v37  ;;  %666 = vmatpush3.bf16.msra.mxu1 %v723_v38 }
  0x24   :  { %645 = vmatprep.subr.bf16.mxu0 %v724_v39  ;;  %667 = vmatprep.subr.bf16.mxu1 %v725_v40 }
  0x27   :  { %646 = vmatpush3.bf16.msra.mxu0 %v726_v41  ;;  %668 = vmatpush3.bf16.msra.mxu1 %v727_v42 }
  0x28   :  { %647 = vmatprep.subr.bf16.mxu0 %v728_v43  ;;  %669 = vmatprep.subr.bf16.mxu1 %v729_v44 }
  0x2b   :  { %648 = vmatpush3.bf16.msra.mxu0 %v730_v45  ;;  %670 = vmatpush3.bf16.msra.mxu1 %v731_v46 }
  0x2c   :  { %649 = vmatprep.subr.bf16.mxu0 %v732_v47  ;;  %671 = vmatprep.subr.bf16.mxu1 %v733_v48 }
  0x2f   :  { %650 = vmatpush3.bf16.msra.mxu0 %v734_v49  ;;  %672 = vmatpush3.bf16.msra.mxu1 %v735_v50 }
  0xe5   :  { %v179_v62 = vpop.f32.mrb[0].mxu0  ;;  %v220_v63 = vpop.f32.mrb[0].mxu1 }
  0xe6   :  { %v180_v0 = vadd.f32 %v179_v62, %v44_v58  ;;  %v221_v1 = vadd.f32 %v220_v63, %v52_v59  ;;  %v181_v2 = vpop.f32.mrb[1].mxu0  ;;  %v222_v3 = vpop.f32.mrb[1].mxu1 }
  0xe7   :  { %v182_v4 = vadd.f32 %v181_v2, %v48_v60  ;;  %v223_v5 = vadd.f32 %v222_v3, %v56_v61  ;;  %v183_v6 = vpop.f32.mrb[2].mxu0  ;;  %v224_v7 = vpop.f32.mrb[2].mxu1 }
  0xe8   :  { %v227_v8 = vmax.f32 %v180_v0, 0.0  ;;  %v229_v9 = vmax.f32 %v221_v1, 0.0  ;;  %v184_v10 = vpop.f32.mrb[3].mxu0  ;;  %v225_v11 = vpop.f32.mrb[3].mxu1 }
  0xe9   :  { %v228_v12 = vmax.f32 %v182_v4, 0.0  ;;  %v230_v13 = vmax.f32 %v223_v5, 0.0 }
  0xea   :  { %v233_v14 = vpack.c.bf16 %v229_v9, %v229_v9  ;;  %v231_v17 = vpack.c.bf16 %v227_v8, %v227_v8 }
  0xeb   :  { %v232_v15 = vpack.c.bf16 %v228_v12, %v228_v12  ;;  %v234_v16 = vpack.c.bf16 %v230_v13, %v230_v13 }
  0xed   :  { %530 = vmatprep.mubr.bf16.mxu0 %v232_v15  ;;  %570 = vmatprep.mubr.bf16.mxu1 %v234_v16 }
  0xee   :  { %531 = vmatmul.mubr.bf16.vlgmr.msra.gmra.mrb[4].mxu0 %v231_v17  ;;  %571 = vmatmul.mubr.bf16.vlgmr.msra.gmra.mrb[4].mxu1 %v233_v14 }
 0x1c1   :  { %v651_v18 = vpop.f32.mrb[4].mxu0  ;;  %v673_v19 = vpop.f32.mrb[4].mxu1 }
 0x1c2   :  { %v652_v21 = vpop.f32.mrb[5].mxu0  ;;  %v674_v22 = vpop.f32.mrb[5].mxu1 }
 0x1c3   :  { %v653_v23 = vadd.f32 %v652_v21, %v651_v18  ;;  %v675_v24 = vadd.f32 %v674_v22, %v673_v19  ;;  %v654_v25 = vpop.f32.mrb[6].mxu0  ;;  %v676_v26 = vpop.f32.mrb[6].mxu1 }
 0x1c4   :  { %v655_v27 = vpop.f32.mrb[7].mxu0  ;;  %v677_v28 = vpop.f32.mrb[7].mxu1 }
 0x1c5   :  { %v533_v29 = vadd.f32 %v653_v23, %v602_v20 }
 0x1c7   :  { %v573_v30 = vadd.f32 %v675_v24, %v533_v29 }
 0x1c9   :  { %579 = vst.msk [vmem:[%s928_s5] sm:$0x3] %vm578_vm1, %v573_v30 }

</bundles_post_ra>
